<compile_context>
chip_gen: v5e
topology: v5e:2x2
jax: 0.10.0
libtpu: 0.0.40
codegen_flags: <defaults>
</compile_context>

<pallas_src>
import math

import jax
import jax.numpy as jnp
from jax import lax
from jax.experimental import pallas as pl
from jax.experimental.pallas import tpu as pltpu

_LANES = 128
_SUBLANES = 8
_CHUNK_ROWS = 256          # rows processed per inner-loop chunk (multiple of 8)


def _device_kind() -> str:
    try:
        return jax.devices()[0].device_kind.lower()
    except Exception:
        return ""


def _default_tile_rows(kind: str) -> int:
    # v5e has slower HBM, so smaller tiles already reach its roofline.
    if ("v5 lite" in kind) or ("v5e" in kind) or ("v5lite" in kind):
        return 8192
    return 16384           # v6e / v7x / unknown


def _default_n_splits(kind: str) -> int:
    # Two TensorCores per chip only on v7x-class parts; on 1-TC chips the
    # split only adds overhead.
    return 2 if "7" in kind else 1


def _make_l2norm_kernel(exp_space: bool, block_rows: int, rows: int,
                        steps: int, steps_per_split: int,
                        mask_last: bool, has_phantom: bool):
    """Build the kernel for static (block_rows, rows, grid) configuration."""
    n_full = block_rows // _CHUNK_ROWS
    rem_rows = block_rows - n_full * _CHUNK_ROWS      # multiple of 8, < chunk

    def kernel(pred_ref, true_ref, out_ref):
        s = pl.program_id(0)                 # split (parallel axis)
        i = pl.program_id(1)                 # reduction step within split
        blk = s * steps_per_split + i        # global block index

        # Resident (8, 128) accumulator block: zero it on the first step of
        # each split (unconditionally, so fully-phantom splits contribute 0).
        @pl.when(i == 0)
        def _():
            out_ref[...] = jnp.zeros_like(out_ref)

        def chunk_partial(row_start, nrows, masked):
            # Load one chunk at native dtype, cast to f32 in-register.
            p = pred_ref[pl.ds(row_start, nrows), :].astype(jnp.float32)
            t = true_ref[pl.ds(row_start, nrows), :].astype(jnp.float32)
            if exp_space:
                p = jnp.exp(p)
                t = jnp.exp(t)
            d = p - t
            if masked:
                # Only the partial last block runs this branch; mask BEFORE
                # squaring so undefined rows (possibly NaN/Inf) are dropped.
                row_ids = lax.broadcasted_iota(jnp.int32, (nrows, _LANES), 0)
                valid = (blk * block_rows + row_start + row_ids) < rows
                d = jnp.where(valid, d, 0.0)
            sq = d * d
            # Pure VPU per-vreg partial sums: (nrows,128) -> (nrows//8,8,128),
            # reduce the leading axis to an (8,128) slab.
            return jnp.sum(
                sq.reshape(nrows // _SUBLANES, _SUBLANES, _LANES), axis=0)

        def accumulate(masked):
            if n_full > 0:
                @pl.loop(0, n_full)
                def _(k):
                    r = pl.multiple_of(k * _CHUNK_ROWS, _CHUNK_ROWS)
                    out_ref[...] += chunk_partial(r, _CHUNK_ROWS, masked)
            if rem_rows:
                out_ref[...] += chunk_partial(n_full * _CHUNK_ROWS,
                                              rem_rows, masked)

        last = steps - 1
        if mask_last:
            # Hot path (all but the last real block) is mask-free.
            @pl.when(blk < last)
            def _():
                accumulate(False)

            @pl.when(blk == last)
            def _():
                accumulate(True)
            # blk > last (phantom blocks of an uneven split): skipped.
        elif has_phantom:
            @pl.when(blk <= last)
            def _():
                accumulate(False)
        else:
            accumulate(False)

    return kernel


def l2_norm(y_pred, y_true, *, exp_space: bool = False, reduce: bool = False,
            tile_rows=None, n_splits=None):
    """Pallas implementation of L2Norm.forward.

    reduce=False (the module's default) -> sum of squared errors.
    reduce=True  -> mean of squared errors (nn.MSELoss default reduction).
    """
    if y_pred.shape != y_true.shape:
        raise ValueError("y_pred and y_true must have the same shape")
    n_elems = int(math.prod(y_pred.shape))
    if n_elems == 0:
        # Empty input: sum of squared errors is 0.
        return jnp.float32(0.0)

    kind = _device_kind()
    if tile_rows is None:
        tile_rows = _default_tile_rows(kind)
    if n_splits is None:
        n_splits = _default_n_splits(kind)

    p_flat = jnp.ravel(y_pred)
    t_flat = jnp.ravel(y_true)
    itembytes = p_flat.dtype.itemsize + t_flat.dtype.itemsize

    # Lane pad: only needed when the element count is not a multiple of 128
    # (for the (rows, 128) reshape). Zero pad contributes exactly 0 to the
    # loss in both plain and exp space (exp(0) - exp(0) = 0).
    lane_pad = (-n_elems) % _LANES
    rows_unpadded = (n_elems + lane_pad) // _LANES

    # Tile sizing: multiple of 8 sublanes, clamped so the double-buffered
    # input blocks stay within ~44 MiB of scoped VMEM (v7x has 64 MiB total).
    max_tile = max(_SUBLANES, (44 << 20) // (2 * _LANES * itembytes))
    tile_req = max(_SUBLANES, min(int(tile_rows), max_tile))
    tile_req -= tile_req % _SUBLANES

    if rows_unpadded >= tile_req:
        block_rows = tile_req
        row_pad = 0
    else:
        # Whole array fits in a single block: align its row count to 8 with a
        # tiny pad (the array is at most one tile) so no masking is needed.
        row_pad = (-rows_unpadded) % _SUBLANES
        block_rows = rows_unpadded + row_pad

    total_pad = lane_pad + row_pad * _LANES
    if total_pad:
        p_flat = jnp.pad(p_flat, (0, total_pad))
        t_flat = jnp.pad(t_flat, (0, total_pad))
    rows = rows_unpadded + row_pad

    steps = pl.cdiv(rows, block_rows)
    n_splits = max(1, min(int(n_splits), steps))
    steps_per_split = pl.cdiv(steps, n_splits)
    has_phantom = (n_splits * steps_per_split) != steps
    mask_last = (rows % block_rows) != 0      # partial last block only

    p2d = p_flat.reshape(rows, _LANES)
    t2d = t_flat.reshape(rows, _LANES)

    if has_phantom:
        def in_map(s, i):
            # Clamp phantom tiles onto the last real block; the kernel skips
            # their compute entirely (pl.when on the block index).
            return (jnp.minimum(s * steps_per_split + i, steps - 1), 0)
    else:
        def in_map(s, i):
            return (s * steps_per_split + i, 0)

    kernel = _make_l2norm_kernel(exp_space, block_rows, rows, steps,
                                 steps_per_split, mask_last, has_phantom)

    # Scoped VMEM: 2 inputs x 2 pipeline buffers x block bytes (+ headroom),
    # capped at 48 MiB so v7x's 64 MiB physical VMEM keeps slack.
    in_block_bytes = block_rows * _LANES * itembytes
    vmem_limit = int(min(max(2 * in_block_bytes + (2 << 20), 16 << 20), 48 << 20))

    cost = pl.CostEstimate(
        flops=3 * n_elems,
        transcendentals=(2 * n_elems) if exp_space else 0,
        bytes_accessed=n_elems * itembytes + n_splits * _SUBLANES * _LANES * 4,
    )

    partials = pl.pallas_call(
        kernel,
        out_shape=jax.ShapeDtypeStruct((n_splits * _SUBLANES, _LANES),
                                       jnp.float32),
        grid_spec=pltpu.PrefetchScalarGridSpec(
            num_scalar_prefetch=0,
            grid=(n_splits, steps_per_split),
            in_specs=[
                pl.BlockSpec((block_rows, _LANES), in_map),
                pl.BlockSpec((block_rows, _LANES), in_map),
            ],
            out_specs=pl.BlockSpec((_SUBLANES, _LANES), lambda s, i: (s, 0)),
        ),
        compiler_params=pltpu.CompilerParams(
            dimension_semantics=("parallel", "arbitrary"),
            vmem_limit_bytes=vmem_limit,
        ),
        cost_estimate=cost,
    )(p2d, t2d)

    # Final reduction of the tiny (n_splits*8, 128) partial-sum slab in XLA.
    result = jnp.sum(partials)
    if reduce:
        result = result / jnp.float32(n_elems)
    return result


def _reference(y_pred, y_true, *, exp_space=False, reduce=False):
    p = y_pred.astype(jnp.float32)
    t = y_true.astype(jnp.float32)
    if exp_space:
        p, t = jnp.exp(p), jnp.exp(t)
    se = (p - t) ** 2
    return jnp.mean(se) if reduce else jnp.sum(se)


if __name__ == "__main__":
    key = jax.random.PRNGKey(0)
    ok = True

    def _check(out, ref, rtol=1e-5, atol=1e-4):
        return bool(jnp.allclose(out, ref, rtol=rtol, atol=atol))

    # Main case: small NCHW-like input (single full block, no masking).
    k1, k2 = jax.random.split(key)
    shape = (2, 4, 16, 16)
    y_pred = jax.random.normal(k1, shape, dtype=jnp.float32)
    y_true = jax.random.normal(k2, shape, dtype=jnp.float32)
    for exp_space in (False, True):
        for reduce in (False, True):
            out = jax.block_until_ready(
                l2_norm(y_pred, y_true, exp_space=exp_space, reduce=reduce))
            ref = _reference(y_pred, y_true, exp_space=exp_space, reduce=reduce)
            ok &= _check(out, ref)

    # Ragged case: lane pad, partial last block (masked path), uneven split
    # (phantom tiles), and the default single-block path.
    k3, k4 = jax.random.split(k1)
    rshape = (3, 5, 17, 13)
    rp = jax.random.normal(k3, rshape, dtype=jnp.float32)
    rt = jax.random.normal(k4, rshape, dtype=jnp.float32)
    rref = _reference(rp, rt)
    for tr, ns in ((16, 2), (8, 3), (None, None)):
        out = jax.block_until_ready(
            l2_norm(rp, rt, exp_space=False, reduce=False,
                    tile_rows=tr, n_splits=ns))
        ok &= _check(out, rref)

    # Larger case exercising the chunked inner pl.loop and a multi-step grid.
    k5, k6 = jax.random.split(k3)
    lshape = (16, 4, 64, 128)                 # 524288 elems -> 4096 rows
    lp = jax.random.normal(k5, lshape, dtype=jnp.float32)
    lt = jax.random.normal(k6, lshape, dtype=jnp.float32)
    lref = _reference(lp, lt)
    for tr, ns in ((None, None), (1024, 2)):
        out = jax.block_until_ready(
            l2_norm(lp, lt, exp_space=False, reduce=False,
                    tile_rows=tr, n_splits=ns))
        ok &= _check(out, lref, rtol=1e-4, atol=1e-2)

    if ok:
        print("KERNEL_OK")
</pallas_src>

<mosaic_0001>
module attributes {stable_mosaic.version = 11 : i64} {
  func.func @kernel(%arg0: i32, %arg1: i32, %arg2: memref<16x128xf32, #tpu.memory_space<vmem>>, %arg3: memref<16x128xf32, #tpu.memory_space<vmem>>, %arg4: memref<8x128xf32, #tpu.memory_space<vmem>>) attributes {dimension_semantics = [#tpu.dimension_semantics<parallel>, #tpu.dimension_semantics<arbitrary>], iteration_bounds = array<i64: 1, 1>, scalar_prefetch = 0 : i64, scratch_operands = 0 : i64, tpu.core_type = #tpu.core_type<tc>, window_params = [{transform_indices = @transform_0, window_bounds = array<i64: 16, 128>}, {transform_indices = @transform_1, window_bounds = array<i64: 16, 128>}, {transform_indices = @transform_2, window_bounds = array<i64: 8, 128>}]} {
    %c0_i32 = arith.constant 0 : i32
    %0 = arith.cmpi eq, %arg1, %c0_i32 : i32
    %1 = arith.extui %0 : i1 to i32
    %c0_i32_0 = arith.constant 0 : i32
    %2 = arith.cmpi ne, %1, %c0_i32_0 : i32
    scf.if %2 {
      %cst_8 = arith.constant 0.000000e+00 : f32
      %12 = vector.broadcast %cst_8 : f32 to vector<8x128xf32>
      %c0_9 = arith.constant 0 : index
      %c0_10 = arith.constant 0 : index
      %13 = vector.load %arg4[%c0_9, %c0_10] : memref<8x128xf32, #tpu.memory_space<vmem>>, vector<8x128xf32>
      tpu.vector_store %arg4[%c0_9, %c0_10], %12 {strides = array<i32>} : memref<8x128xf32, #tpu.memory_space<vmem>>, vector<8x128xf32>,
    } else {
    }
    %c0 = arith.constant 0 : index
    %c0_1 = arith.constant 0 : index
    %3 = vector.load %arg4[%c0, %c0_1] : memref<8x128xf32, #tpu.memory_space<vmem>>, vector<8x128xf32>
    %c0_2 = arith.constant 0 : index
    %c0_3 = arith.constant 0 : index
    %4 = vector.load %arg2[%c0_2, %c0_3] : memref<16x128xf32, #tpu.memory_space<vmem>>, vector<16x128xf32>
    %c0_4 = arith.constant 0 : index
    %c0_5 = arith.constant 0 : index
    %5 = vector.load %arg3[%c0_4, %c0_5] : memref<16x128xf32, #tpu.memory_space<vmem>>, vector<16x128xf32>
    %6 = arith.subf %4, %5 : vector<16x128xf32>
    %7 = arith.mulf %6, %6 : vector<16x128xf32>
    %8 = vector.shape_cast %7 : vector<16x128xf32> to vector<2x8x128xf32>
    %cst = arith.constant dense<0.000000e+00> : vector<8x128xf32>
    %9 = vector.multi_reduction <add>, %8, %cst [0] : vector<2x8x128xf32> to vector<8x128xf32>
    %10 = arith.addf %3, %9 : vector<8x128xf32>
    %c0_6 = arith.constant 0 : index
    %c0_7 = arith.constant 0 : index
    %11 = vector.load %arg4[%c0_6, %c0_7] : memref<8x128xf32, #tpu.memory_space<vmem>>, vector<8x128xf32>
    tpu.vector_store %arg4[%c0_6, %c0_7], %10 {strides = array<i32>} : memref<8x128xf32, #tpu.memory_space<vmem>>, vector<8x128xf32>,
    return
  }
  func.func @transform_0(%arg0: i32, %arg1: i32) -> (i32, i32) {
    %c1_i32 = arith.constant 1 : i32
    %0 = arith.muli %arg0, %c1_i32 : i32
    %1 = arith.addi %0, %arg1 : i32
    %c0_i32 = arith.constant 0 : i32
    %c0_i32_0 = arith.constant 0 : i32
    return %1, %c0_i32 : i32, i32
  }
  func.func @transform_1(%arg0: i32, %arg1: i32) -> (i32, i32) {
    %c1_i32 = arith.constant 1 : i32
    %0 = arith.muli %arg0, %c1_i32 : i32
    %1 = arith.addi %0, %arg1 : i32
    %c0_i32 = arith.constant 0 : i32
    %c0_i32_0 = arith.constant 0 : i32
    return %1, %c0_i32 : i32, i32
  }
  func.func @transform_2(%arg0: i32, %arg1: i32) -> (i32, i32) {
    %c0_i32 = arith.constant 0 : i32
    %c0_i32_0 = arith.constant 0 : i32
    return %arg0, %c0_i32 : i32, i32
  }
}

</mosaic_0001>

<bundles_post_ra>
// kernel: tpu_custom_call.1
= control target key start
LH: loop header
LB: loop body
LE: loop exit
PB: predicated region body
PF: predicated region fallthrough
CT: control target
= control target key end

     0   :  { %7 = vsyncpa [#allocation3], 0  ;;  %s204_s0 = inlined_call_operand.hbm [shape: f32[16,128], index: 0, kind: input, shape index: {}]   ;;  %s205_s1 = inlined_call_operand.hbm [shape: f32[16,128], index: 1, kind: input, shape index: {}]   ;;  %s206_s2 = inlined_call_operand.hbm [shape: f32[8,128], index: 2, kind: output, shape index: {}]  }
   0x1   :  { %8 = vsyncpa [#allocation6], 0 }
   0x2   :  { %9 = vsyncpa [#allocation4], 0  ;;  %s18_s11 = sshll.u32 %s204_s0, 4  ;;  %s175_s12 = smov [#allocation2]   ;;  %s19_s11 = int_to_ptr.hbm [resolvable:$true] %s18_s11 }
   0x3   :  { %s20_s13 = sshll.u32 %s175_s12, 4  ;;  %s35_s16 = sshll.u32 %s205_s1, 4  ;;  %s21_s13 = int_to_ptr.vmem [resolvable:$true] %s20_s13  ;;  %s36_s16 = int_to_ptr.hbm [resolvable:$true] %s35_s16 }
   0x4   :  { %s176_s17 = smov 128   ;;  %s177_s18 = smov 8  }
   0x5   :  { %26 = dma.hbm_to_vmem [thread:$0]  %s19_s11, 256, %s21_s13, [#allocation3], %s176_s17, %s176_s17, %s177_s18  }
   0x6   :  { %s178_s19 = smov [#allocation5]  }
   0x7   :  { %s37_s20 = sshll.u32 %s178_s19, 4  ;;  %s38_s20 = int_to_ptr.vmem [resolvable:$true] %s37_s20 }
   0x8   :  { %43 = dma.hbm_to_vmem [thread:$0]  %s36_s16, 256, %s38_s20, [#allocation6], %s176_s17, %s176_s17, %s177_s18  }
   0x9   :  { %169 = dma.done.wait [#allocation3], 256  }
   0xa   :  { %170 = vsyncadd [#allocation3], 4294967040 }
   0xb   :  { %171 = dma.done.wait [#allocation6], 256  }
   0xc   :  { %172 = vsyncadd [#allocation6], 4294967040  ;;  %v62_v0 = vld [vmem:[#allocation2] sm:$0xff]  ;;  %v63_v1 = vld [vmem:[#allocation2 + $0x8] sm:$0xff]  ;;  %s179_s0 = smov [#allocation7]   ;;  %s80_s23 = sshll.u32 %s206_s2, 4  ;;  %s81_s23 = int_to_ptr.hbm [resolvable:$true] %s80_s23 }
   0xd   :  { %v64_v2 = vld [vmem:[#allocation5] sm:$0xff]  ;;  %v65_v3 = vld [vmem:[#allocation5 + $0x8] sm:$0xff]  ;;  %s78_s1 = sshll.u32 %s179_s0, 4  ;;  %s79_s1 = int_to_ptr.vmem [resolvable:$true] %s78_s1 }
   0xe   :  { %v66_v4 = vsub.f32 %v62_v0, %v64_v2  ;;  %v67_v5 = vsub.f32 %v63_v1, %v65_v3 }
  0x10   :  { %v68_v6 = vmul.f32 %v66_v4, %v66_v4  ;;  %v69_v7 = vmul.f32 %v67_v5, %v67_v5 }
  0x12   :  { %v70_v8 = vadd.f32 %v69_v7, %v68_v6 }
  0x14   :  { %72 = vst [vmem:[#allocation7] sm:$0xff] %v70_v8 }
  0x15   :  { %83 = dma.vmem_to_hbm [thread:$0]  %s79_s1, 128, %s81_s23, [#allocation4]  }
  0x16   :  { %173 = dma.done.wait [#allocation4], 128  }
  0x17   :  { %174 = vsyncadd [#allocation4], 4294967168 }
  0x18   :  { %88 = vsyncpa [#allocation3], 1 }
  0x19   :  { %89 = vsyncpa [#allocation6], 1 }
  0x1a   :  { %90 = vsyncpa [#allocation4], 1 }

</bundles_post_ra>
